<compile_context>
chip_gen: v5e
topology: v5e:2x2
jax: 0.10.0
libtpu: 0.0.40
codegen_flags: <defaults>
</compile_context>

<pallas_src>
import functools

import jax
import jax.numpy as jnp
from jax.experimental import pallas as pl
from jax.experimental.pallas import tpu as pltpu


def dwsep_conv_kernel(x_ref, dw_w_ref, mix_ref, bias_ref, o_ref, *,
                      tap_offsets, hw):
    """Single grid step over the whole (small) batch.

    x_ref:    (N*Cin, HWp)     zero-padded flattened input (spatial on lanes)
    dw_w_ref: (N*Cin, KH*KW)   depthwise tap weights, one lane-column per tap
    mix_ref:  (N*Cout, N*Cin)  block-diagonal pointwise mixing matrix
    bias_ref: (N*Cout, 1)      fused (depthwise + pointwise) bias
    o_ref:    (N*Cout, HW)     flattened output (valid positions cropped later)
    """
    x = x_ref[...]                      # (N*Cin, HWp) f32
    dw_w = dw_w_ref[...]                # (N*Cin, KH*KW)

    # Depthwise valid conv: KH*KW lane-shifted broadcast MACs, full-width acc.
    # acc[r, p] = sum_d x[r, p + d] * w[r, d]  (garbage at invalid p, cropped
    # by the wrapper; padded x keeps all reads in bounds).
    acc = jnp.zeros((x.shape[0], hw), jnp.float32)
    for t, d in enumerate(tap_offsets):
        w_col = dw_w[:, t:t + 1]                         # (N*Cin, 1) per-row scalar
        acc = acc + x[:, d:d + hw].astype(jnp.float32) * w_col

    # Pointwise 1x1 conv: one lane-dense MXU matmul (lane dim = HW >= 128).
    y = jnp.dot(mix_ref[...], acc, preferred_element_type=jnp.float32)
    y = y + bias_ref[...]                                # broadcast over lanes
    o_ref[...] = y.astype(o_ref.dtype)


def depthwise_separable_conv2d(x_nchw, dw_weight, dw_bias, pw_weight, pw_bias):
    """Matches nn.Conv2d(groups=Cin, padding='valid') -> nn.Conv2d(1x1).

    x_nchw:    (N, Cin, H, W)
    dw_weight: (Cin, 1, KH, KW)     (PyTorch depthwise layout)
    dw_bias:   (Cin,)
    pw_weight: (Cout, Cin, 1, 1)
    pw_bias:   (Cout,)
    returns:   (N, Cout, H-KH+1, W-KW+1)
    """
    N, Cin, H, W = x_nchw.shape
    KH, KW = int(dw_weight.shape[2]), int(dw_weight.shape[3])
    Cout = int(pw_weight.shape[0])
    Hout, Wout = H - KH + 1, W - KW + 1
    HW = H * W

    # Flat tap offsets (cross-correlation, matching PyTorch conv semantics).
    tap_offsets = tuple(i * W + j for i in range(KH) for j in range(KW))
    d_max = tap_offsets[-1]
    pad = ((d_max + 127) // 128) * 128          # keep padded width lane-aligned
    HWp = HW + pad

    # Free reshape NCHW -> (N*Cin, H*W), then a tiny zero pad on the lane axis.
    x_flat = x_nchw.reshape(N * Cin, HW)
    x_pad = jnp.pad(x_flat, ((0, 0), (0, pad)))

    # Depthwise tap weights per (batch*channel) row: (N*Cin, KH*KW).
    dw_taps = dw_weight[:, 0, :, :].reshape(Cin, KH * KW)
    dw_taps = jnp.tile(dw_taps, (N, 1))

    # Pointwise weights as a block-diagonal mixing matrix so the kernel can do
    # a single lane-dense matmul over the whole batch: out = Mix @ acc.
    pw = pw_weight[:, :, 0, 0]                                  # (Cout, Cin)
    mix = jnp.kron(jnp.eye(N, dtype=pw.dtype), pw)              # (N*Cout, N*Cin)

    # Fold the depthwise bias into the pointwise bias (1x1 conv is linear).
    fused_b = pw_bias + pw @ dw_bias                            # (Cout,)
    bias = jnp.tile(fused_b, (N,)).reshape(N * Cout, 1)

    kernel = functools.partial(dwsep_conv_kernel,
                               tap_offsets=tap_offsets, hw=HW)

    flops = 2 * N * HW * (Cin * KH * KW) + 2 * (N * Cout) * (N * Cin) * HW
    bytes_accessed = 4 * (x_pad.size + dw_taps.size + mix.size + bias.size
                          + N * Cout * HW)

    out_flat = pl.pallas_call(
        kernel,
        out_shape=jax.ShapeDtypeStruct((N * Cout, HW), x_nchw.dtype),
        grid=(1,),
        in_specs=[
            pl.BlockSpec((N * Cin, HWp), lambda i: (0, 0)),
            pl.BlockSpec((N * Cin, KH * KW), lambda i: (0, 0)),
            pl.BlockSpec((N * Cout, N * Cin), lambda i: (0, 0)),
            pl.BlockSpec((N * Cout, 1), lambda i: (0, 0)),
        ],
        out_specs=pl.BlockSpec((N * Cout, HW), lambda i: (0, 0)),
        compiler_params=pltpu.CompilerParams(
            dimension_semantics=("arbitrary",)),
        cost_estimate=pl.CostEstimate(flops=flops, transcendentals=0,
                                      bytes_accessed=bytes_accessed),
    )(x_pad, dw_taps, mix, bias)

    # Valid output positions are p = h*W + w with h < Hout, w < Wout.
    out = out_flat.reshape(N, Cout, H, W)[:, :, :Hout, :Wout]
    return out


def reference_forward(x, dw_weight, dw_bias, pw_weight, pw_bias):
    """Plain-JAX reference (lax conv) for correctness checking."""
    Cin = x.shape[1]
    y = jax.lax.conv_general_dilated(
        x, dw_weight, window_strides=(1, 1), padding='VALID',
        feature_group_count=Cin,
        dimension_numbers=('NCHW', 'OIHW', 'NCHW'))
    y = y + dw_bias.reshape(1, -1, 1, 1)
    z = jax.lax.conv_general_dilated(
        y, pw_weight, window_strides=(1, 1), padding='VALID',
        dimension_numbers=('NCHW', 'OIHW', 'NCHW'))
    z = z + pw_bias.reshape(1, -1, 1, 1)
    return z


if __name__ == "__main__":
    # Small shapes consistent with the module's forward (NCHW input).
    N, Cin, H, W = 2, 4, 16, 16
    Cout, K = 8, 3

    key = jax.random.PRNGKey(0)
    kx, k1, k2, k3, k4 = jax.random.split(key, 5)

    x = jax.random.normal(kx, (N, Cin, H, W), dtype=jnp.float32)
    dw_weight = 0.1 * jax.random.normal(k1, (Cin, 1, K, K), dtype=jnp.float32)
    dw_bias = 0.1 * jax.random.normal(k2, (Cin,), dtype=jnp.float32)
    pw_weight = 0.1 * jax.random.normal(k3, (Cout, Cin, 1, 1), dtype=jnp.float32)
    pw_bias = 0.1 * jax.random.normal(k4, (Cout,), dtype=jnp.float32)

    out = depthwise_separable_conv2d(x, dw_weight, dw_bias, pw_weight, pw_bias)
    out = jax.block_until_ready(out)

    ref = reference_forward(x, dw_weight, dw_bias, pw_weight, pw_bias)
    assert out.shape == (N, Cout, H - K + 1, W - K + 1), out.shape
    assert jnp.allclose(out, ref, atol=1e-4, rtol=1e-4), "mismatch vs reference"

    print("KERNEL_OK")
</pallas_src>

<mosaic_0001>
module attributes {stable_mosaic.version = 11 : i64} {
  func.func @dwsep_conv_kernel(%arg0: i32, %arg1: memref<8x384xf32, #tpu.memory_space<vmem>>, %arg2: memref<8x9xf32, #tpu.memory_space<vmem>>, %arg3: memref<16x8xf32, #tpu.memory_space<vmem>>, %arg4: memref<16x1xf32, #tpu.memory_space<vmem>>, %arg5: memref<16x256xf32, #tpu.memory_space<vmem>>) attributes {dimension_semantics = [#tpu.dimension_semantics<arbitrary>], iteration_bounds = array<i64: 1>, scalar_prefetch = 0 : i64, scratch_operands = 0 : i64, tpu.core_type = #tpu.core_type<tc>, window_params = [{pipeline_mode = #tpu.pipeline_mode<synchronous>, transform_indices = @transform_0, window_bounds = array<i64: 8, 384>}, {pipeline_mode = #tpu.pipeline_mode<synchronous>, transform_indices = @transform_1, window_bounds = array<i64: 8, 9>}, {pipeline_mode = #tpu.pipeline_mode<synchronous>, transform_indices = @transform_2, window_bounds = array<i64: 16, 8>}, {pipeline_mode = #tpu.pipeline_mode<synchronous>, transform_indices = @transform_3, window_bounds = array<i64: 16, 1>}, {pipeline_mode = #tpu.pipeline_mode<synchronous>, transform_indices = @transform_4, window_bounds = array<i64: 16, 256>}]} {
    %c0 = arith.constant 0 : index
    %c0_0 = arith.constant 0 : index
    %0 = vector.load %arg1[%c0, %c0_0] : memref<8x384xf32, #tpu.memory_space<vmem>>, vector<8x384xf32>
    %c0_1 = arith.constant 0 : index
    %c0_2 = arith.constant 0 : index
    %1 = vector.load %arg2[%c0_1, %c0_2] : memref<8x9xf32, #tpu.memory_space<vmem>>, vector<8x9xf32>
    %cst = arith.constant 0.000000e+00 : f32
    %2 = vector.broadcast %cst : f32 to vector<8x256xf32>
    %3 = vector.extract_strided_slice %1 {offsets = [0, 0], sizes = [8, 1], strides = [1, 1]} : vector<8x9xf32> to vector<8x1xf32>
    %4 = vector.extract_strided_slice %0 {offsets = [0, 0], sizes = [8, 256], strides = [1, 1]} : vector<8x384xf32> to vector<8x256xf32>
    %5 = vector.broadcast %3 : vector<8x1xf32> to vector<8x256xf32>
    %6 = arith.mulf %4, %5 : vector<8x256xf32>
    %7 = arith.addf %2, %6 : vector<8x256xf32>
    %8 = vector.extract_strided_slice %1 {offsets = [0, 1], sizes = [8, 1], strides = [1, 1]} : vector<8x9xf32> to vector<8x1xf32>
    %9 = vector.extract_strided_slice %0 {offsets = [0, 1], sizes = [8, 256], strides = [1, 1]} : vector<8x384xf32> to vector<8x256xf32>
    %10 = vector.broadcast %8 : vector<8x1xf32> to vector<8x256xf32>
    %11 = arith.mulf %9, %10 : vector<8x256xf32>
    %12 = arith.addf %7, %11 : vector<8x256xf32>
    %13 = vector.extract_strided_slice %1 {offsets = [0, 2], sizes = [8, 1], strides = [1, 1]} : vector<8x9xf32> to vector<8x1xf32>
    %14 = vector.extract_strided_slice %0 {offsets = [0, 2], sizes = [8, 256], strides = [1, 1]} : vector<8x384xf32> to vector<8x256xf32>
    %15 = vector.broadcast %13 : vector<8x1xf32> to vector<8x256xf32>
    %16 = arith.mulf %14, %15 : vector<8x256xf32>
    %17 = arith.addf %12, %16 : vector<8x256xf32>
    %18 = vector.extract_strided_slice %1 {offsets = [0, 3], sizes = [8, 1], strides = [1, 1]} : vector<8x9xf32> to vector<8x1xf32>
    %19 = vector.extract_strided_slice %0 {offsets = [0, 16], sizes = [8, 256], strides = [1, 1]} : vector<8x384xf32> to vector<8x256xf32>
    %20 = vector.broadcast %18 : vector<8x1xf32> to vector<8x256xf32>
    %21 = arith.mulf %19, %20 : vector<8x256xf32>
    %22 = arith.addf %17, %21 : vector<8x256xf32>
    %23 = vector.extract_strided_slice %1 {offsets = [0, 4], sizes = [8, 1], strides = [1, 1]} : vector<8x9xf32> to vector<8x1xf32>
    %24 = vector.extract_strided_slice %0 {offsets = [0, 17], sizes = [8, 256], strides = [1, 1]} : vector<8x384xf32> to vector<8x256xf32>
    %25 = vector.broadcast %23 : vector<8x1xf32> to vector<8x256xf32>
    %26 = arith.mulf %24, %25 : vector<8x256xf32>
    %27 = arith.addf %22, %26 : vector<8x256xf32>
    %28 = vector.extract_strided_slice %1 {offsets = [0, 5], sizes = [8, 1], strides = [1, 1]} : vector<8x9xf32> to vector<8x1xf32>
    %29 = vector.extract_strided_slice %0 {offsets = [0, 18], sizes = [8, 256], strides = [1, 1]} : vector<8x384xf32> to vector<8x256xf32>
    %30 = vector.broadcast %28 : vector<8x1xf32> to vector<8x256xf32>
    %31 = arith.mulf %29, %30 : vector<8x256xf32>
    %32 = arith.addf %27, %31 : vector<8x256xf32>
    %33 = vector.extract_strided_slice %1 {offsets = [0, 6], sizes = [8, 1], strides = [1, 1]} : vector<8x9xf32> to vector<8x1xf32>
    %34 = vector.extract_strided_slice %0 {offsets = [0, 32], sizes = [8, 256], strides = [1, 1]} : vector<8x384xf32> to vector<8x256xf32>
    %35 = vector.broadcast %33 : vector<8x1xf32> to vector<8x256xf32>
    %36 = arith.mulf %34, %35 : vector<8x256xf32>
    %37 = arith.addf %32, %36 : vector<8x256xf32>
    %38 = vector.extract_strided_slice %1 {offsets = [0, 7], sizes = [8, 1], strides = [1, 1]} : vector<8x9xf32> to vector<8x1xf32>
    %39 = vector.extract_strided_slice %0 {offsets = [0, 33], sizes = [8, 256], strides = [1, 1]} : vector<8x384xf32> to vector<8x256xf32>
    %40 = vector.broadcast %38 : vector<8x1xf32> to vector<8x256xf32>
    %41 = arith.mulf %39, %40 : vector<8x256xf32>
    %42 = arith.addf %37, %41 : vector<8x256xf32>
    %43 = vector.extract_strided_slice %1 {offsets = [0, 8], sizes = [8, 1], strides = [1, 1]} : vector<8x9xf32> to vector<8x1xf32>
    %44 = vector.extract_strided_slice %0 {offsets = [0, 34], sizes = [8, 256], strides = [1, 1]} : vector<8x384xf32> to vector<8x256xf32>
    %45 = vector.broadcast %43 : vector<8x1xf32> to vector<8x256xf32>
    %46 = arith.mulf %44, %45 : vector<8x256xf32>
    %47 = arith.addf %42, %46 : vector<8x256xf32>
    %c0_3 = arith.constant 0 : index
    %c0_4 = arith.constant 0 : index
    %48 = vector.load %arg3[%c0_3, %c0_4] : memref<16x8xf32, #tpu.memory_space<vmem>>, vector<16x8xf32>
    %cst_5 = arith.constant dense<0.000000e+00> : vector<16x256xf32>
    %49 = tpu.matmul %48, %47, %cst_5 {dimension_numbers = #tpu.dot_dimension_numbers<[1], [0], [0], [1], [0, 0, 1, 1], [], []>} : vector<16x8xf32>, vector<8x256xf32>, vector<16x256xf32> -> vector<16x256xf32>
    %c0_6 = arith.constant 0 : index
    %c0_7 = arith.constant 0 : index
    %50 = vector.load %arg4[%c0_6, %c0_7] : memref<16x1xf32, #tpu.memory_space<vmem>>, vector<16x1xf32>
    %51 = vector.broadcast %50 : vector<16x1xf32> to vector<16x256xf32>
    %52 = arith.addf %49, %51 : vector<16x256xf32>
    %c0_8 = arith.constant 0 : index
    %c0_9 = arith.constant 0 : index
    %53 = vector.load %arg5[%c0_8, %c0_9] : memref<16x256xf32, #tpu.memory_space<vmem>>, vector<16x256xf32>
    tpu.vector_store %arg5[%c0_8, %c0_9], %52 {strides = array<i32>} : memref<16x256xf32, #tpu.memory_space<vmem>>, vector<16x256xf32>,
    return
  }
  func.func @transform_0(%arg0: i32) -> (i32, i32) {
    %c0_i32 = arith.constant 0 : i32
    %c0_i32_0 = arith.constant 0 : i32
    %c0_i32_1 = arith.constant 0 : i32
    return %c0_i32, %c0_i32_0 : i32, i32
  }
  func.func @transform_1(%arg0: i32) -> (i32, i32) {
    %c0_i32 = arith.constant 0 : i32
    %c0_i32_0 = arith.constant 0 : i32
    %c0_i32_1 = arith.constant 0 : i32
    return %c0_i32, %c0_i32_0 : i32, i32
  }
  func.func @transform_2(%arg0: i32) -> (i32, i32) {
    %c0_i32 = arith.constant 0 : i32
    %c0_i32_0 = arith.constant 0 : i32
    %c0_i32_1 = arith.constant 0 : i32
    return %c0_i32, %c0_i32_0 : i32, i32
  }
  func.func @transform_3(%arg0: i32) -> (i32, i32) {
    %c0_i32 = arith.constant 0 : i32
    %c0_i32_0 = arith.constant 0 : i32
    %c0_i32_1 = arith.constant 0 : i32
    return %c0_i32, %c0_i32_0 : i32, i32
  }
  func.func @transform_4(%arg0: i32) -> (i32, i32) {
    %c0_i32 = arith.constant 0 : i32
    %c0_i32_0 = arith.constant 0 : i32
    %c0_i32_1 = arith.constant 0 : i32
    return %c0_i32, %c0_i32_0 : i32, i32
  }
}

</mosaic_0001>

<bundles_post_ra>
// kernel: tpu_custom_call.1
= control target key start
LH: loop header
LB: loop body
LE: loop exit
PB: predicated region body
PF: predicated region fallthrough
CT: control target
= control target key end

     0   :  { %v366_v1 = vmov 1   ;;  %v367_v2 = vmov 3   ;;  %s480_s0 = inlined_call_operand.vmem [shape: f32[8,384], index: 0, kind: input, shape index: {}]   ;;  %s481_s1 = inlined_call_operand.vmem [shape: f32[8,9], index: 1, kind: input, shape index: {}]   ;;  %s482_s2 = inlined_call_operand.vmem [shape: f32[16,8], index: 2, kind: input, shape index: {}]   ;;  %s483_s3 = inlined_call_operand.vmem [shape: f32[16,1], index: 3, kind: input, shape index: {}]   ;;  %s484_s4 = inlined_call_operand.hbm [shape: f32[16,256], index: 4, kind: output, shape index: {}]  }
   0x1   :  { %v21_v0 = vld [vmem:[%s481_s1] sm:$0xff]  ;;  %330 = vset.pattern.permute.xlu0 %v366_v1  ;;  %332 = vset.pattern.permute.xlu1 %v367_v2 }
   0x2   :  { %32 = vperm.xlu0 %330, %v21_v0   ;;  %78 = vperm.xlu1 %332, %v21_v0  }
   0x3   :  { %9 = vsyncpa [#allocation3], 0  ;;  %v368_v3 = vmov 5   ;;  %v369_v4 = vmov 2   ;;  %v370_v5 = vmov 4   ;;  %v371_v6 = vmov 6  }
   0x4   :  { %334 = vset.pattern.permute.xlu2 %v368_v3  ;;  %v372_v7 = vmov 7   ;;  %v373_v8 = vmov 8   ;;  %v374_v9 = vmov 0   ;;  %v417_v10 = vld [vmem:[%s480_s0] sm:$0xff]  ;;  %v422_v11 = vld [vmem:[%s480_s0 + $0x8] sm:$0xff]  ;;  %s375_s20 = smov 127  }
   0x5   :  { %124 = vperm.xlu2 %334, %v21_v0   ;;  %v20_v15 = vld [vmem:[%s480_s0 + $0x10] sm:$0xff]  ;;  %s376_s23 = smov 126   ;;  %s377_s24 = smov 112   ;;  %v218_v45 = vld [vmem:[%s483_s3 + $0x8] sm:$0xff]  ;;  %v217_v62 = vld [vmem:[%s483_s3] sm:$0xff]  ;;  %vm47_vm0 = vcmask 1039360  }
   0x6   :  { %s378_s0 = smov 111   ;;  %s379_s25 = smov 110   ;;  %vm70_vm1 = vcmask 1031168   ;;  %vm93_vm2 = vcmask 916480   ;;  %vm116_vm3 = vcmask 908288   ;;  %vm139_vm4 = vcmask 900096  }
   0x7   :  { %s380_s26 = smov 96   ;;  %s381_s27 = smov 95   ;;  %vm162_vm5 = vcmask 785408   ;;  %vm185_vm6 = vcmask 777216   ;;  %vm208_vm7 = vcmask 769024   ;;  %vm229_vm8 = vcmask 64512  }
   0x8   :  { %s382_s28 = smov 94   ;;  %s292_s13 = sshll.u32 %s484_s4, 4  ;;  %s293_s13 = int_to_ptr.hbm [resolvable:$true] %s292_s13 }
   0x9   :  { %s384_s14 = smov 256   ;;  %s385_s15 = smov 16  }
   0xa   :  { %331 = vset.pattern.permute.xlu0 %v369_v4  ;;  %333 = vset.pattern.permute.xlu1 %v370_v5 }
   0xb   :  { %55 = vperm.xlu0 %331, %v21_v0   ;;  %101 = vperm.xlu1 %333, %v21_v0  }
   0xd   :  { %335 = vset.pattern.permute.xlu2 %v371_v6 }
   0xe   :  { %147 = vperm.xlu2 %335, %v21_v0  }
  0x13   :  { %336 = vset.pattern.permute.xlu1 %v372_v7  ;;  %338 = vset.pattern.permute.xlu0 %v374_v9 }
  0x14   :  { %170 = vperm.xlu1 %336, %v21_v0   ;;  %24 = vperm.xlu0 %338, %v21_v0  }
  0x16   :  { %337 = vset.pattern.permute.xlu2 %v373_v8 }
  0x17   :  { %193 = vperm.xlu2 %337, %v21_v0  }
  0x1f   :  { %339 = vset.pattern.permute.xlu2 %v374_v9 }
  0x5f   :  { %v125_v28 = vpop.permute.xlu2 %124 }
  0x60   :  { %v127_v30 = vmul.f32 %v125_v28, %v417_v10  ;;  %v128_v31 = vmul.f32 %v125_v28, %v422_v11  ;;  %v129_v33 = vmul.f32 %v125_v28, %v20_v15 }
  0x68   :  { %v148_v32 = vpop.permute.xlu2 %147 }
  0x69   :  { %v150_v34 = vmul.f32 %v148_v32, %v417_v10  ;;  %v151_v35 = vmul.f32 %v148_v32, %v422_v11  ;;  %v152_v37 = vmul.f32 %v148_v32, %v20_v15 }
  0x71   :  { %v194_v40 = vpop.permute.xlu2 %193 }
  0x72   :  { %v196_v42 = vmul.f32 %v194_v40, %v417_v10  ;;  %v197_v43 = vmul.f32 %v194_v40, %v422_v11  ;;  %v198_v44 = vmul.f32 %v194_v40, %v20_v15 }
  0x74   :  { %v33_v12 = vpop.permute.xlu0 %32  ;;  %v79_v20 = vpop.permute.xlu1 %78 }
  0x75   :  { %v35_v13 = vmul.f32 %v33_v12, %v417_v10  ;;  %v36_v14 = vmul.f32 %v33_v12, %v422_v11  ;;  %v37_v16 = vmul.f32 %v33_v12, %v20_v15  ;;  %v81_v22 = vmul.f32 %v79_v20, %v417_v10 }
  0x76   :  { %v82_v23 = vmul.f32 %v79_v20, %v422_v11  ;;  %v83_v25 = vmul.f32 %v79_v20, %v20_v15 }
  0x77   :  { %43 = vrot.lane.b32.xlu2 %v36_v14, %s375_s20  ;;  %41 = vrot.lane.b32.xlu1 %v35_v13, %s375_s20 }
  0x7d   :  { %v56_v17 = vpop.permute.xlu0 %55  ;;  %v102_v24 = vpop.permute.xlu1 %101 }
  0x7e   :  { %v58_v18 = vmul.f32 %v56_v17, %v417_v10  ;;  %v59_v19 = vmul.f32 %v56_v17, %v422_v11  ;;  %v60_v21 = vmul.f32 %v56_v17, %v20_v15  ;;  %v104_v26 = vmul.f32 %v102_v24, %v417_v10 }
  0x7f   :  { %45 = vrot.lane.b32.xlu1 %v37_v16, %s375_s20  ;;  %v105_v27 = vmul.f32 %v102_v24, %v422_v11  ;;  %v106_v29 = vmul.f32 %v102_v24, %v20_v15 }
  0x80   :  { %66 = vrot.lane.b32.xlu0 %v59_v19, %s376_s23  ;;  %64 = vrot.lane.b32.xlu2 %v58_v18, %s376_s23 }
  0x86   :  { %v171_v36 = vpop.permute.xlu1 %170  ;;  %v25_v49 = vpop.permute.xlu0 %24 }
  0x87   :  { %68 = vrot.lane.b32.xlu1 %v60_v21, %s376_s23  ;;  %v173_v38 = vmul.f32 %v171_v36, %v417_v10  ;;  %v174_v39 = vmul.f32 %v171_v36, %v422_v11  ;;  %v175_v41 = vmul.f32 %v171_v36, %v20_v15  ;;  %v27_v0 = vmul.f32 %v25_v49, %v417_v10  ;;  %v215_v36 = vld [vmem:[%s482_s2] sm:$0xff] }
  0x88   :  { %89 = vrot.lane.b32.xlu0 %v82_v23, %s377_s24  ;;  %87 = vrot.lane.b32.xlu2 %v81_v22, %s377_s24  ;;  %v28_v8 = vmul.f32 %v25_v49, %v422_v11 }
  0x8f   :  { %91 = vrot.lane.b32.xlu1 %v83_v25, %s377_s24 }
  0x90   :  { %112 = vrot.lane.b32.xlu0 %v105_v27, %s378_s0  ;;  %110 = vrot.lane.b32.xlu2 %v104_v26, %s378_s0 }
  0x97   :  { %114 = vrot.lane.b32.xlu1 %v106_v29, %s378_s0 }
  0x98   :  { %135 = vrot.lane.b32.xlu0 %v128_v31, %s379_s25  ;;  %133 = vrot.lane.b32.xlu2 %v127_v30, %s379_s25 }
  0x9f   :  { %137 = vrot.lane.b32.xlu1 %v129_v33, %s379_s25 }
  0xa0   :  { %158 = vrot.lane.b32.xlu0 %v151_v35, %s380_s26  ;;  %156 = vrot.lane.b32.xlu2 %v150_v34, %s380_s26  ;;  %v216_v35 = vld [vmem:[%s482_s2 + $0x8] sm:$0xff]  ;;  %s383_s2 = smov [#allocation2]  }
  0xa1   :  { %s290_s10 = sshll.u32 %s383_s2, 4  ;;  %s291_s10 = int_to_ptr.vmem [resolvable:$true] %s290_s10 }
  0xa7   :  { %160 = vrot.lane.b32.xlu1 %v152_v37, %s380_s26 }
  0xa8   :  { %181 = vrot.lane.b32.xlu0 %v174_v39, %s381_s27  ;;  %179 = vrot.lane.b32.xlu2 %v173_v38, %s381_s27 }
  0xaf   :  { %183 = vrot.lane.b32.xlu1 %v175_v41, %s381_s27 }
  0xb0   :  { %204 = vrot.lane.b32.xlu0 %v197_v43, %s382_s28  ;;  %202 = vrot.lane.b32.xlu2 %v196_v42, %s382_s28 }
  0xb7   :  { %206 = vrot.lane.b32.xlu1 %v198_v44, %s382_s28 }
  0xb8   :  { %226 = vperm.xlu0 %338, %v218_v45   ;;  %221 = vperm.xlu2 %339, %v217_v62  }
  0xd1   :  { %v44_v46 = vpop.permute.xlu2 %43 }
  0xda   :  { %v65_v47 = vpop.permute.xlu2 %64 }
  0xe2   :  { %v88_v50 = vpop.permute.xlu2 %87 }
  0xe9   :  { %v42_v48 = vpop.permute.xlu1 %41 }
  0xea   :  { %v111_v54 = vpop.permute.xlu2 %110  ;;  %v48_v2 = vsel %vm47_vm0, %v42_v48, %v44_v46 }
  0xeb   :  { %v52_v4 = vadd.f32 %v48_v2, %v27_v0 }
  0xf1   :  { %v46_v51 = vpop.permute.xlu1 %45 }
  0xf2   :  { %v67_v52 = vpop.permute.xlu0 %66  ;;  %v134_v58 = vpop.permute.xlu2 %133  ;;  %v49_v10 = vsel %vm47_vm0, %v44_v46, %v46_v51 }
  0xf3   :  { %v71_v3 = vsel %vm70_vm1, %v65_v47, %v67_v52  ;;  %v53_v18 = vadd.f32 %v49_v10, %v28_v8 }
  0xf4   :  { %v75_v6 = vadd.f32 %v71_v3, %v52_v4 }
  0xf9   :  { %v69_v53 = vpop.permute.xlu1 %68 }
  0xfa   :  { %v90_v55 = vpop.permute.xlu0 %89  ;;  %v157_v61 = vpop.permute.xlu2 %156  ;;  %v72_v16 = vsel %vm70_vm1, %v67_v52, %v69_v53 }
  0xfb   :  { %v94_v5 = vsel %vm93_vm2, %v88_v50, %v90_v55  ;;  %v76_v21 = vadd.f32 %v72_v16, %v53_v18 }
  0xfc   :  { %v98_v13 = vadd.f32 %v94_v5, %v75_v6 }
 0x101   :  { %v92_v56 = vpop.permute.xlu1 %91 }
 0x102   :  { %v113_v57 = vpop.permute.xlu0 %112  ;;  %v180_v7 = vpop.permute.xlu2 %179  ;;  %v95_v20 = vsel %vm93_vm2, %v90_v55, %v92_v56 }
 0x103   :  { %v117_v9 = vsel %vm116_vm3, %v111_v54, %v113_v57  ;;  %v99_v25 = vadd.f32 %v95_v20, %v76_v21 }
 0x104   :  { %v121_v17 = vadd.f32 %v117_v9, %v98_v13 }
 0x109   :  { %v115_v59 = vpop.permute.xlu1 %114 }
 0x10a   :  { %v136_v60 = vpop.permute.xlu0 %135  ;;  %v118_v23 = vsel %vm116_vm3, %v113_v57, %v115_v59  ;;  %v203_v27 = vpop.permute.xlu2 %202 }
 0x10b   :  { %v140_v15 = vsel %vm139_vm4, %v134_v58, %v136_v60  ;;  %v122_v31 = vadd.f32 %v118_v23, %v99_v25 }
 0x10c   :  { %v144_v11 = vadd.f32 %v140_v15, %v121_v17 }
 0x111   :  { %v138_v63 = vpop.permute.xlu1 %137 }
 0x112   :  { %v159_v1 = vpop.permute.xlu0 %158  ;;  %v141_v28 = vsel %vm139_vm4, %v136_v60, %v138_v63  ;;  %v222_v44 = vpop.permute.xlu2 %221 }
 0x113   :  { %v163_v19 = vsel %vm162_vm5, %v157_v61, %v159_v1  ;;  %v145_v37 = vadd.f32 %v141_v28, %v122_v31 }
 0x114   :  { %v167_v24 = vadd.f32 %v163_v19, %v144_v11 }
 0x119   :  { %v161_v12 = vpop.permute.xlu1 %160 }
 0x11a   :  { %v182_v14 = vpop.permute.xlu0 %181  ;;  %v164_v33 = vsel %vm162_vm5, %v159_v1, %v161_v12 }
 0x11b   :  { %v186_v22 = vsel %vm185_vm6, %v180_v7, %v182_v14  ;;  %v168_v39 = vadd.f32 %v164_v33, %v145_v37 }
 0x11c   :  { %v190_v29 = vadd.f32 %v186_v22, %v167_v24 }
 0x121   :  { %v184_v26 = vpop.permute.xlu1 %183 }
 0x122   :  { %v205_v30 = vpop.permute.xlu0 %204  ;;  %v187_v38 = vsel %vm185_vm6, %v182_v14, %v184_v26 }
 0x123   :  { %v209_v32 = vsel %vm208_vm7, %v203_v27, %v205_v30  ;;  %v191_v40 = vadd.f32 %v187_v38, %v168_v39 }
 0x124   :  { %v213_v34 = vadd.f32 %v209_v32, %v190_v29 }
 0x126   :  { %251 = vmatpush.msra.mxu0 %v213_v34  ;;  %308 = vmatpush.msra.mxu2 %v213_v34 }
 0x127   :  { %305 = vmatmul.msk.f32.vlgmr.msra.gmra.mxu2 %vm229_vm8, %v216_v35  ;;  %304 = vmatmul.msk.f32.vlgmr.msra.gmra.mxu0 %vm229_vm8, %v215_v36 }
 0x129   :  { %v207_v41 = vpop.permute.xlu1 %206 }
 0x12a   :  { %v210_v42 = vsel %vm208_vm7, %v205_v30, %v207_v41  ;;  %v227_v47 = vpop.permute.xlu0 %226 }
 0x12b   :  { %v214_v43 = vadd.f32 %v210_v42, %v191_v40 }
 0x12d   :  { %274 = vmatpush.msra.mxu1 %v214_v43  ;;  %309 = vmatpush.msra.mxu3 %v214_v43 }
 0x12e   :  { %307 = vmatmul.msk.f32.vlgmr.msra.gmra.mxu3 %vm229_vm8, %v216_v35  ;;  %306 = vmatmul.msk.f32.vlgmr.msra.gmra.mxu1 %vm229_vm8, %v215_v36 }
 0x1a4   :  { %v253_v45 = vpop.f32.mrf.mxu0 }
 0x1a5   :  { %v254_v46 = vadd.f32 %v253_v45, %v222_v44 }
 0x1a7   :  { %282 = vst [vmem:[#allocation2] sm:$0xff] %v254_v46 }
 0x1aa   :  { %v256_v48 = vpop.f32.mrf.mxu2 }
 0x1ab   :  { %v257_v49 = vadd.f32 %v256_v48, %v227_v47  ;;  %v276_v50 = vpop.f32.mrf.mxu1 }
 0x1ac   :  { %v277_v51 = vadd.f32 %v276_v50, %v222_v44 }
 0x1ad   :  { %284 = vst [vmem:[#allocation2 + $0x10] sm:$0xff] %v257_v49 }
 0x1ae   :  { %283 = vst [vmem:[#allocation2 + $0x8] sm:$0xff] %v277_v51 }
 0x1b1   :  { %v279_v52 = vpop.f32.mrf.mxu3 }
 0x1b2   :  { %v280_v53 = vadd.f32 %v279_v52, %v227_v47 }
 0x1b4   :  { %285 = vst [vmem:[#allocation2 + $0x18] sm:$0xff] %v280_v53 }
 0x1b5   :  { %298 = dma.vmem_to_hbm [thread:$0]  %s291_s10, 512, %s293_s13, [#allocation3], %s384_s14, %s384_s14, %s385_s15  }
 0x1b6   :  { %364 = dma.done.wait [#allocation3], 512  }
 0x1b7   :  { %365 = vsyncadd [#allocation3], 4294966784 }
 0x1b8   :  { %303 = vsyncpa [#allocation3], 1 }

</bundles_post_ra>
